<compile_context>
chip_gen: v7x
topology: tpu7x:2x2x1
jax: 0.10.0
libtpu: 0.0.40
codegen_flags: <defaults>
</compile_context>

<pallas_src>
import jax
import jax.numpy as jnp
from jax.experimental import pallas as pl
from jax.experimental.pallas import tpu as pltpu

_BN_EPS = 1e-5
_INV_SQRT2 = 0.7071067811865476

# Abramowitz & Stegun 7.1.26 erf constants; the GELU argument scaling 1/sqrt(2)
# is folded into the rational term (saves one VALU multiply per element).
_ERF_P = 0.3275911 * _INV_SQRT2
_ERF_A = (0.254829592, -0.284496736, 1.421413741, -1.453152027, 1.061405429)


def _gelu(x):
    """GELU (erf form), matching nn.GELU() defaults.

    erf polynomial |abs err| <= 1.5e-7; the reciprocal uses the exact EUP path
    (approx=False), so overall error is dominated by the polynomial itself.
    """
    a1, a2, a3, a4, a5 = _ERF_A
    ax = jnp.abs(x)
    t = pl.reciprocal(1.0 + _ERF_P * ax, approx=False)        # EUP
    poly = t * (a1 + t * (a2 + t * (a3 + t * (a4 + t * a5))))
    erf_abs = 1.0 - poly * jnp.exp(-0.5 * x * x)               # erf(|x|/sqrt(2)), EUP exp
    erf_s = jnp.where(x >= 0.0, erf_abs, -erf_abs)
    return 0.5 * x * (1.0 + erf_s)


def _mixer_kernel(x_ref, w_ref, b_ref, o_ref, y_sc):
    # x_ref: (1, C, tile_w)          streamed column slab (bf16/f32), one image
    # w_ref: (2, C, C)      f32      BN-folded 1x1-conv weights (resident)
    # b_ref: (2, C, 1)      f32      BN-folded biases (natural column, no lane shuffle)
    # o_ref: (1, C, h_blk, tile_w)   f32 output block (mixed columns replicated over H)
    # y_sc : (C, tile_w)    f32      scratch carrying the result across the inner H axis
    @pl.when(pl.program_id(2) == 0)
    def _compute():
        x = x_ref[0].astype(jnp.float32)                                   # (C, tile_w)
        h = jnp.dot(w_ref[0], x, preferred_element_type=jnp.float32) + b_ref[0]
        h = _gelu(h)
        h = jnp.dot(w_ref[1], h, preferred_element_type=jnp.float32) + b_ref[1]
        h = _gelu(h)
        y_sc[...] = x + h                                                  # residual (in_ch == out_ch)

    # H replication fused into the output store: sublane broadcast of the scratch,
    # re-stored for every H block without recomputing the mixer.  Ragged edge
    # W tiles only contain garbage in masked lanes (no lane reductions anywhere).
    o_ref[...] = jnp.broadcast_to(y_sc[...][None, :, None, :], o_ref.shape)


def _tpu_vmem_capacity_bytes():
    try:
        cap = getattr(pltpu.get_tpu_info(), "vmem_capacity_bytes", None)
        if cap:
            return int(cap)
    except Exception:
        pass
    return 64 << 20          # v7x has the smallest per-core VMEM; be conservative


def _vmem_budget_bytes(C, h_blk, tile_w, x_itemsize):
    """Double-buffered in/out blocks + resident weights + scratch + GELU temps."""
    lane = ((max(tile_w, 1) + 127) // 128) * 128
    sub_h = ((h_blk + 7) // 8) * 8
    sub_c = ((C + 7) // 8) * 8
    x_blk = sub_c * lane * x_itemsize
    o_blk = sub_c * sub_h * lane * 4
    w_blk = 2 * sub_c * (((C + 127) // 128) * 128) * 4
    b_blk = 2 * sub_c * 128 * 4
    y_sc = sub_c * lane * 4
    tmps = 3 * sub_c * lane * 4
    return 2 * (x_blk + o_blk) + 2 * (w_blk + b_blk) + y_sc + tmps


def _choose_tiles(C, H, W, max_tile_w, x_itemsize):
    """Pick (tile_w, h_blk, vmem_limit_bytes) against this generation's VMEM."""
    cap = _tpu_vmem_capacity_bytes()
    target = cap // 3                      # keep full double-buffering with headroom
    max_tile_w = max(128, int(max_tile_w))
    tile_w = W if W <= max_tile_w else (max_tile_w // 128) * 128   # full W or 128-multiple
    h_blk = H
    while h_blk >= 16 and _vmem_budget_bytes(C, h_blk, tile_w, x_itemsize) > target:
        h_blk = max(8, (h_blk // 2) // 8 * 8)
    # TODO(synk): also shrink tile_w in 128-steps if a single 8-row H block still
    # exceeds the budget (only reachable for C*W far beyond realistic decoders).
    budget = _vmem_budget_bytes(C, h_blk, tile_w, x_itemsize)
    vmem_limit = max(32 << 20, min(int(budget * 1.5) + (4 << 20), cap * 3 // 4))
    return tile_w, h_blk, int(vmem_limit)


def fold_bn_into_conv(w, gamma, beta, mean, var, eps=_BN_EPS):
    """w: (C_out, C_in) 1x1-conv weight. Folds eval-mode BatchNorm into (W', bias)."""
    scale = gamma / jnp.sqrt(var + eps)              # (C_out,)
    return w * scale[:, None], beta - mean * scale


def column_decoder_forward(tokens, col_idx, missing_tok, w_packed, b_packed,
                           *, H, W, max_tile_w=2048, stream_dtype=jnp.bfloat16):
    """tokens: (N, C, M); col_idx: (M,) int32 column indices (the col_mask).

    Mirrors ColumnDecoder.forward with eval-mode BatchNorm; returns (N, C, H, W) f32.
    """
    N, C, M = tokens.shape

    # full = missing_tok.view(1,C,1).expand(N,C,W); full[:, :, col_mask] = tokens
    # Built directly in the (N, C, W) layout the kernel consumes (H not expanded).
    full_nw = jnp.broadcast_to(missing_tok[None, :, None], (N, C, W))
    full_nw = full_nw.at[:, :, col_idx].set(tokens)
    x_in = full_nw.astype(stream_dtype)          # HBM-bound kernel: stream the slab narrow

    w_packed = w_packed.astype(jnp.float32)      # 2*C*C floats, fetched once: keep exact
    b_packed = b_packed.astype(jnp.float32)

    x_bytes = x_in.dtype.itemsize
    tile_w, h_blk, vmem_limit = _choose_tiles(C, H, W, max_tile_w, x_bytes)
    grid = (N, pl.cdiv(W, tile_w), pl.cdiv(H, h_blk))
    # TODO(synk): if N == 1 and the W grid collapses to a single step, split W (or H)
    # in two so both v7x TensorCores get work.

    out = pl.pallas_call(
        _mixer_kernel,
        out_shape=jax.ShapeDtypeStruct((N, C, H, W), jnp.float32),
        grid_spec=pltpu.PrefetchScalarGridSpec(
            num_scalar_prefetch=0,
            grid=grid,
            in_specs=[
                pl.BlockSpec((1, C, tile_w), lambda n, j, h: (n, 0, j)),   # h-invariant
                pl.BlockSpec((2, C, C), lambda n, j, h: (0, 0, 0)),        # resident
                pl.BlockSpec((2, C, 1), lambda n, j, h: (0, 0, 0)),        # resident
            ],
            out_specs=pl.BlockSpec((1, C, h_blk, tile_w),
                                   lambda n, j, h: (n, 0, h, j)),
            scratch_shapes=[pltpu.VMEM((C, tile_w), jnp.float32)]),
        compiler_params=pltpu.CompilerParams(
            dimension_semantics=("parallel", "parallel", "arbitrary"),
            vmem_limit_bytes=vmem_limit),
        cost_estimate=pl.CostEstimate(
            flops=4 * C * C * N * W,            # two (C,C)x(C,W) matmuls per image
            transcendentals=4 * C * N * W,      # exp + reciprocal per GELU, two GELUs
            bytes_accessed=(N * C * W * x_bytes + N * C * H * W * 4
                            + 8 * C * C + 8 * C)),
    )(x_in, w_packed, b_packed)
    return out


def _reference(tokens, col_idx, missing_tok, w1, g1, b1, m1, v1,
               w2, g2, b2, m2, v2, *, H, W):
    """Pure-JAX reference of ColumnDecoder.forward (eval-mode BN, exact GELU)."""
    N, C, M = tokens.shape
    full_w = jnp.broadcast_to(missing_tok[None, :, None], (N, C, W))
    full_w = full_w.at[:, :, col_idx].set(tokens)
    x = jnp.broadcast_to(full_w[:, :, None, :], (N, C, H, W))

    def block(z, w, g, b, m, v):
        h = jnp.einsum("oc,nchw->nohw", w, z)
        h = (h - m[None, :, None, None]) * jax.lax.rsqrt(v + _BN_EPS)[None, :, None, None]
        h = h * g[None, :, None, None] + b[None, :, None, None]
        return 0.5 * h * (1.0 + jax.scipy.special.erf(h * _INV_SQRT2))

    y = block(x, w1, g1, b1, m1, v1)
    y = block(y, w2, g2, b2, m2, v2)
    return x + y


if __name__ == "__main__":
    N, C, M, H, W = 2, 32, 8, 16, 16
    key = jax.random.PRNGKey(0)
    ks = jax.random.split(key, 5)

    tokens = jax.random.normal(ks[0], (N, C, M), jnp.float32)
    col_idx = jnp.array([0, 2, 5, 7, 9, 11, 12, 15], jnp.int32)   # col_mask as indices
    missing_tok = jnp.zeros((C,), jnp.float32)                    # nn.Parameter(zeros)

    def conv_w(k):
        # Conv2d(C, C, 1, bias=False).weight squeezed to (C_out, C_in)
        return jax.random.normal(k, (C, C), jnp.float32) * (1.0 / jnp.sqrt(C))

    def bn_params(k):
        k1, k2, k3, k4 = jax.random.split(k, 4)
        gamma = 1.0 + 0.1 * jax.random.normal(k1, (C,), jnp.float32)
        beta = 0.1 * jax.random.normal(k2, (C,), jnp.float32)
        mean = 0.1 * jax.random.normal(k3, (C,), jnp.float32)
        var = 1.0 + 0.1 * jax.random.uniform(k4, (C,), jnp.float32)
        return gamma, beta, mean, var

    w1 = conv_w(ks[1]); w2 = conv_w(ks[2])
    g1, b1, m1, v1 = bn_params(ks[3])
    g2, b2, m2, v2 = bn_params(ks[4])

    # fold eval-mode BatchNorm into the 1x1 conv weights + biases (wrapper-side)
    w1f, bias1 = fold_bn_into_conv(w1, g1, b1, m1, v1)
    w2f, bias2 = fold_bn_into_conv(w2, g2, b2, m2, v2)
    w_packed = jnp.stack([w1f, w2f], axis=0)                  # (2, C, C)
    b_packed = jnp.stack([bias1, bias2], axis=0)[:, :, None]  # (2, C, 1)

    out = column_decoder_forward(tokens, col_idx, missing_tok, w_packed, b_packed,
                                 H=H, W=W)
    out = jax.block_until_ready(out)
    assert out.shape == (N, C, H, W)
    assert out.dtype == jnp.float32

    # sanity check against the pure-JAX reference; tolerance covers the bf16
    # input streaming + erf polynomial (BN folding / H replication are exact algebra)
    ref = _reference(tokens, col_idx, missing_tok,
                     w1, g1, b1, m1, v1, w2, g2, b2, m2, v2, H=H, W=W)
    max_err = float(jnp.max(jnp.abs(out - ref)))
    assert max_err < 5e-2, f"max abs error too large: {max_err}"

    print("KERNEL_OK")
</pallas_src>

<mosaic_0001>
module attributes {stable_mosaic.version = 11 : i64} {
  func.func @_mixer_kernel(%arg0: i32, %arg1: i32, %arg2: i32, %arg3: memref<1x32x16xbf16, #tpu.memory_space<vmem>>, %arg4: memref<2x32x32xf32, #tpu.memory_space<vmem>>, %arg5: memref<2x32x1xf32, #tpu.memory_space<vmem>>, %arg6: memref<1x32x16x16xf32, #tpu.memory_space<vmem>>, %arg7: memref<32x16xf32, #tpu.memory_space<vmem>>) attributes {dimension_semantics = [#tpu.dimension_semantics<parallel>, #tpu.dimension_semantics<parallel>, #tpu.dimension_semantics<arbitrary>], iteration_bounds = array<i64: 2, 1, 1>, scalar_prefetch = 0 : i64, scratch_operands = 1 : i64, tpu.core_type = #tpu.core_type<tc>, window_params = [{transform_indices = @transform_0, window_bounds = array<i64: 1, 32, 16>}, {pipeline_mode = #tpu.pipeline_mode<synchronous>, transform_indices = @transform_1, window_bounds = array<i64: 2, 32, 32>}, {pipeline_mode = #tpu.pipeline_mode<synchronous>, transform_indices = @transform_2, window_bounds = array<i64: 2, 32, 1>}, {transform_indices = @transform_3, window_bounds = array<i64: 1, 32, 16, 16>}]} {
    %c0_i32 = arith.constant 0 : i32
    %0 = arith.cmpi eq, %arg2, %c0_i32 : i32
    %1 = arith.extui %0 : i1 to i32
    %c0_i32_0 = arith.constant 0 : i32
    %2 = arith.cmpi ne, %1, %c0_i32_0 : i32
    scf.if %2 {
      %c0_6 = arith.constant 0 : index
      %c0_7 = arith.constant 0 : index
      %c0_8 = arith.constant 0 : index
      %8 = vector.load %arg3[%c0_6, %c0_7, %c0_8] : memref<1x32x16xbf16, #tpu.memory_space<vmem>>, vector<1x32x16xbf16>
      %9 = vector.shape_cast %8 : vector<1x32x16xbf16> to vector<32x16xbf16>
      %10 = arith.extf %9 : vector<32x16xbf16> to vector<32x16xf32>
      %c0_9 = arith.constant 0 : index
      %c0_10 = arith.constant 0 : index
      %c0_11 = arith.constant 0 : index
      %11 = vector.load %arg4[%c0_9, %c0_10, %c0_11] : memref<2x32x32xf32, #tpu.memory_space<vmem>>, vector<1x32x32xf32>
      %12 = vector.shape_cast %11 : vector<1x32x32xf32> to vector<32x32xf32>
      %cst = arith.constant dense<0.000000e+00> : vector<32x16xf32>
      %13 = tpu.matmul %12, %10, %cst {dimension_numbers = #tpu.dot_dimension_numbers<[1], [0], [0], [1], [0, 0, 1, 1], [], []>} : vector<32x32xf32>, vector<32x16xf32>, vector<32x16xf32> -> vector<32x16xf32>
      %c0_12 = arith.constant 0 : index
      %c0_13 = arith.constant 0 : index
      %c0_14 = arith.constant 0 : index
      %14 = vector.load %arg5[%c0_12, %c0_13, %c0_14] : memref<2x32x1xf32, #tpu.memory_space<vmem>>, vector<1x32x1xf32>
      %15 = vector.shape_cast %14 : vector<1x32x1xf32> to vector<32x1xf32>
      %16 = vector.broadcast %15 : vector<32x1xf32> to vector<32x16xf32>
      %17 = arith.addf %13, %16 : vector<32x16xf32>
      %18 = math.absf %17 : vector<32x16xf32>
      %cst_15 = arith.constant 0.231641889 : f32
      %19 = vector.broadcast %cst_15 : f32 to vector<32x16xf32>
      %20 = arith.mulf %19, %18 : vector<32x16xf32>
      %cst_16 = arith.constant 1.000000e+00 : f32
      %21 = vector.broadcast %cst_16 : f32 to vector<32x16xf32>
      %22 = arith.addf %21, %20 : vector<32x16xf32>
      %23 = tpu.reciprocal %22 : vector<32x16xf32> -> vector<32x16xf32>
      %cst_17 = arith.constant 1.06140542 : f32
      %24 = vector.broadcast %cst_17 : f32 to vector<32x16xf32>
      %25 = arith.mulf %23, %24 : vector<32x16xf32>
      %cst_18 = arith.constant -1.45315206 : f32
      %26 = vector.broadcast %cst_18 : f32 to vector<32x16xf32>
      %27 = arith.addf %26, %25 : vector<32x16xf32>
      %28 = arith.mulf %23, %27 : vector<32x16xf32>
      %cst_19 = arith.constant 1.42141378 : f32
      %29 = vector.broadcast %cst_19 : f32 to vector<32x16xf32>
      %30 = arith.addf %29, %28 : vector<32x16xf32>
      %31 = arith.mulf %23, %30 : vector<32x16xf32>
      %cst_20 = arith.constant -0.284496725 : f32
      %32 = vector.broadcast %cst_20 : f32 to vector<32x16xf32>
      %33 = arith.addf %32, %31 : vector<32x16xf32>
      %34 = arith.mulf %23, %33 : vector<32x16xf32>
      %cst_21 = arith.constant 0.254829586 : f32
      %35 = vector.broadcast %cst_21 : f32 to vector<32x16xf32>
      %36 = arith.addf %35, %34 : vector<32x16xf32>
      %37 = arith.mulf %23, %36 : vector<32x16xf32>
      %cst_22 = arith.constant -5.000000e-01 : f32
      %38 = vector.broadcast %cst_22 : f32 to vector<32x16xf32>
      %39 = arith.mulf %38, %17 : vector<32x16xf32>
      %40 = arith.mulf %39, %17 : vector<32x16xf32>
      %41 = math.exp %40 : vector<32x16xf32>
      %42 = arith.mulf %37, %41 : vector<32x16xf32>
      %cst_23 = arith.constant 1.000000e+00 : f32
      %43 = vector.broadcast %cst_23 : f32 to vector<32x16xf32>
      %44 = arith.subf %43, %42 : vector<32x16xf32>
      %cst_24 = arith.constant 0.000000e+00 : f32
      %45 = vector.broadcast %cst_24 : f32 to vector<32x16xf32>
      %46 = arith.cmpf oge, %17, %45 : vector<32x16xf32>
      %cst_25 = arith.constant 0.000000e+00 : f32
      %47 = vector.broadcast %cst_25 : f32 to vector<32x16xf32>
      %48 = arith.subf %47, %44 : vector<32x16xf32>
      %49 = arith.select %46, %44, %48 : vector<32x16xi1>, vector<32x16xf32>
      %cst_26 = arith.constant 5.000000e-01 : f32
      %50 = vector.broadcast %cst_26 : f32 to vector<32x16xf32>
      %51 = arith.mulf %50, %17 : vector<32x16xf32>
      %cst_27 = arith.constant 1.000000e+00 : f32
      %52 = vector.broadcast %cst_27 : f32 to vector<32x16xf32>
      %53 = arith.addf %52, %49 : vector<32x16xf32>
      %54 = arith.mulf %51, %53 : vector<32x16xf32>
      %c1 = arith.constant 1 : index
      %c0_28 = arith.constant 0 : index
      %c0_29 = arith.constant 0 : index
      %55 = vector.load %arg4[%c1, %c0_28, %c0_29] : memref<2x32x32xf32, #tpu.memory_space<vmem>>, vector<1x32x32xf32>
      %56 = vector.shape_cast %55 : vector<1x32x32xf32> to vector<32x32xf32>
      %cst_30 = arith.constant dense<0.000000e+00> : vector<32x16xf32>
      %57 = tpu.matmul %56, %54, %cst_30 {dimension_numbers = #tpu.dot_dimension_numbers<[1], [0], [0], [1], [0, 0, 1, 1], [], []>} : vector<32x32xf32>, vector<32x16xf32>, vector<32x16xf32> -> vector<32x16xf32>
      %c1_31 = arith.constant 1 : index
      %c0_32 = arith.constant 0 : index
      %c0_33 = arith.constant 0 : index
      %58 = vector.load %arg5[%c1_31, %c0_32, %c0_33] : memref<2x32x1xf32, #tpu.memory_space<vmem>>, vector<1x32x1xf32>
      %59 = vector.shape_cast %58 : vector<1x32x1xf32> to vector<32x1xf32>
      %60 = vector.broadcast %59 : vector<32x1xf32> to vector<32x16xf32>
      %61 = arith.addf %57, %60 : vector<32x16xf32>
      %62 = math.absf %61 : vector<32x16xf32>
      %cst_34 = arith.constant 0.231641889 : f32
      %63 = vector.broadcast %cst_34 : f32 to vector<32x16xf32>
      %64 = arith.mulf %63, %62 : vector<32x16xf32>
      %cst_35 = arith.constant 1.000000e+00 : f32
      %65 = vector.broadcast %cst_35 : f32 to vector<32x16xf32>
      %66 = arith.addf %65, %64 : vector<32x16xf32>
      %67 = tpu.reciprocal %66 : vector<32x16xf32> -> vector<32x16xf32>
      %cst_36 = arith.constant 1.06140542 : f32
      %68 = vector.broadcast %cst_36 : f32 to vector<32x16xf32>
      %69 = arith.mulf %67, %68 : vector<32x16xf32>
      %cst_37 = arith.constant -1.45315206 : f32
      %70 = vector.broadcast %cst_37 : f32 to vector<32x16xf32>
      %71 = arith.addf %70, %69 : vector<32x16xf32>
      %72 = arith.mulf %67, %71 : vector<32x16xf32>
      %cst_38 = arith.constant 1.42141378 : f32
      %73 = vector.broadcast %cst_38 : f32 to vector<32x16xf32>
      %74 = arith.addf %73, %72 : vector<32x16xf32>
      %75 = arith.mulf %67, %74 : vector<32x16xf32>
      %cst_39 = arith.constant -0.284496725 : f32
      %76 = vector.broadcast %cst_39 : f32 to vector<32x16xf32>
      %77 = arith.addf %76, %75 : vector<32x16xf32>
      %78 = arith.mulf %67, %77 : vector<32x16xf32>
      %cst_40 = arith.constant 0.254829586 : f32
      %79 = vector.broadcast %cst_40 : f32 to vector<32x16xf32>
      %80 = arith.addf %79, %78 : vector<32x16xf32>
      %81 = arith.mulf %67, %80 : vector<32x16xf32>
      %cst_41 = arith.constant -5.000000e-01 : f32
      %82 = vector.broadcast %cst_41 : f32 to vector<32x16xf32>
      %83 = arith.mulf %82, %61 : vector<32x16xf32>
      %84 = arith.mulf %83, %61 : vector<32x16xf32>
      %85 = math.exp %84 : vector<32x16xf32>
      %86 = arith.mulf %81, %85 : vector<32x16xf32>
      %cst_42 = arith.constant 1.000000e+00 : f32
      %87 = vector.broadcast %cst_42 : f32 to vector<32x16xf32>
      %88 = arith.subf %87, %86 : vector<32x16xf32>
      %cst_43 = arith.constant 0.000000e+00 : f32
      %89 = vector.broadcast %cst_43 : f32 to vector<32x16xf32>
      %90 = arith.cmpf oge, %61, %89 : vector<32x16xf32>
      %cst_44 = arith.constant 0.000000e+00 : f32
      %91 = vector.broadcast %cst_44 : f32 to vector<32x16xf32>
      %92 = arith.subf %91, %88 : vector<32x16xf32>
      %93 = arith.select %90, %88, %92 : vector<32x16xi1>, vector<32x16xf32>
      %cst_45 = arith.constant 5.000000e-01 : f32
      %94 = vector.broadcast %cst_45 : f32 to vector<32x16xf32>
      %95 = arith.mulf %94, %61 : vector<32x16xf32>
      %cst_46 = arith.constant 1.000000e+00 : f32
      %96 = vector.broadcast %cst_46 : f32 to vector<32x16xf32>
      %97 = arith.addf %96, %93 : vector<32x16xf32>
      %98 = arith.mulf %95, %97 : vector<32x16xf32>
      %99 = arith.addf %10, %98 : vector<32x16xf32>
      %c0_47 = arith.constant 0 : index
      %c0_48 = arith.constant 0 : index
      %100 = vector.load %arg7[%c0_47, %c0_48] : memref<32x16xf32, #tpu.memory_space<vmem>>, vector<32x16xf32>
      tpu.vector_store %arg7[%c0_47, %c0_48], %99 {strides = array<i32>} : memref<32x16xf32, #tpu.memory_space<vmem>>, vector<32x16xf32>,
    } else {
    }
    %c0 = arith.constant 0 : index
    %c0_1 = arith.constant 0 : index
    %3 = vector.load %arg7[%c0, %c0_1] : memref<32x16xf32, #tpu.memory_space<vmem>>, vector<32x16xf32>
    %4 = vector.shape_cast %3 : vector<32x16xf32> to vector<1x32x1x16xf32>
    %5 = vector.shape_cast %4 : vector<1x32x1x16xf32> to vector<1x32x1x16xf32>
    %6 = vector.broadcast %5 : vector<1x32x1x16xf32> to vector<1x32x16x16xf32>
    %c0_2 = arith.constant 0 : index
    %c0_3 = arith.constant 0 : index
    %c0_4 = arith.constant 0 : index
    %c0_5 = arith.constant 0 : index
    %7 = vector.load %arg6[%c0_2, %c0_3, %c0_4, %c0_5] : memref<1x32x16x16xf32, #tpu.memory_space<vmem>>, vector<1x32x16x16xf32>
    tpu.vector_store %arg6[%c0_2, %c0_3, %c0_4, %c0_5], %6 {strides = array<i32>} : memref<1x32x16x16xf32, #tpu.memory_space<vmem>>, vector<1x32x16x16xf32>,
    return
  }
  func.func @transform_0(%arg0: i32, %arg1: i32, %arg2: i32) -> (i32, i32, i32) {
    %c0_i32 = arith.constant 0 : i32
    %c0_i32_0 = arith.constant 0 : i32
    return %arg0, %c0_i32, %arg1 : i32, i32, i32
  }
  func.func @transform_1(%arg0: i32, %arg1: i32, %arg2: i32) -> (i32, i32, i32) {
    %c0_i32 = arith.constant 0 : i32
    %c0_i32_0 = arith.constant 0 : i32
    %c0_i32_1 = arith.constant 0 : i32
    %c0_i32_2 = arith.constant 0 : i32
    return %c0_i32, %c0_i32_0, %c0_i32_1 : i32, i32, i32
  }
  func.func @transform_2(%arg0: i32, %arg1: i32, %arg2: i32) -> (i32, i32, i32) {
    %c0_i32 = arith.constant 0 : i32
    %c0_i32_0 = arith.constant 0 : i32
    %c0_i32_1 = arith.constant 0 : i32
    %c0_i32_2 = arith.constant 0 : i32
    return %c0_i32, %c0_i32_0, %c0_i32_1 : i32, i32, i32
  }
  func.func @transform_3(%arg0: i32, %arg1: i32, %arg2: i32) -> (i32, i32, i32, i32) {
    %c0_i32 = arith.constant 0 : i32
    %c0_i32_0 = arith.constant 0 : i32
    return %arg0, %c0_i32, %arg2, %arg1 : i32, i32, i32, i32
  }
}

</mosaic_0001>

<bundles_post_ra>
// kernel: tpu_custom_call.1
= control target key start
LH: loop header
LB: loop body
LE: loop exit
PB: predicated region body
PF: predicated region fallthrough
CT: control target
= control target key end

     0   :  { %s1431_s12 = smov 0   ;;  %s1433_s13 = smov 0   ;;  %s1786_s0 = inlined_call_operand.vmem [shape: bf16[2,32,16], index: 0, kind: input, shape index: {}]   ;;  %s1787_s1 = inlined_call_operand.vmem [shape: f32[2,32,32], index: 1, kind: input, shape index: {}]   ;;  %s1788_s2 = inlined_call_operand.vmem [shape: f32[2,32,1], index: 2, kind: input, shape index: {}]   ;;  %s1789_s3 = inlined_call_operand.vmem [shape: f32[2,32,16,16], index: 3, kind: output, shape index: {}]  }
   0x1   :  { %s1435_s14 = smov 0  }
   0x2 LB: > { %s32_s15 = sadd.s32 1, %s1403_s13  ;;  %p1227_p0 = scmp.ge.s32.totalorder %s1407_s14, 1  ;;  %s1407_s14 = sphi %s1435_s14, %s13_s14   ;;  %s1403_s13 = sphi %s1433_s13, %s1791_s13   ;;  %s1399_s12 = sphi %s1431_s12, %s1790_s12  }
   0x3   : > { %p34_p1 = scmp.ge.s32.totalorder %s32_s15, 2  ;;  %p165_p2 = scmp.lt.s32.totalorder %s1407_s14, 3 }
   0x5   : > { %s1793_s15 = smov (%p34_p1, %s32_s15), 0  ;;  %p166_p3 = pnand %p1227_p0, %p165_p2 }
   0x6   : > { %p199_p4 = scmp.lt.s32.totalorder (!%p166_p3), %s1399_s12, 1  ;;  %v232_v0 = vld [vmem:[%s1787_s1] sm:$0xff] (!%p166_p3)  ;;  %vm260_vm0 = vcmask (!%p166_p3), 261120   ;;  %v1409_v1 = vmov (!%p166_p3), 0   ;;  %v238_v3 = vld [vmem:[%s1788_s2 + $0x10] sm:$0xff] (!%p166_p3)  ;;  %v237_v4 = vld [vmem:[%s1788_s2 + $0x8] sm:$0xff] (!%p166_p3) }
   0x7   : > { %169 = sbr.rel (%p166_p3) target bundleno = 607 (0x25f), region = 32  ;;  %1285 = vmatprep.mubr.msk.f32.mxu0 (!%p166_p3), %vm260_vm0, %v232_v0  ;;  %1347 = vset.pattern.permute.xlu0 (!%p166_p3), %v1409_v1  ;;  %v236_v2 = vld [vmem:[%s1788_s2] sm:$0xff] (!%p166_p3)  ;;  %v239_v5 = vld [vmem:[%s1788_s2 + $0x18] sm:$0xff] (!%p166_p3)  ;;  %v1241_v9 = vld [vmem:[%s1788_s2 + $0x28] sm:$0xff] (!%p166_p3)  ;;  %vm689_vm8 = vcmask (!%p166_p3), 130048  }
   0x8   : > { %242 = vperm.xlu0 (!%p166_p3), %1347, %v236_v2   ;;  %1348 = vset.pattern.permute.xlu1 (!%p166_p3), %v1409_v1  ;;  %v1240_v8 = vld [vmem:[%s1788_s2 + $0x20] sm:$0xff] (!%p166_p3)  ;;  %v1242_v10 = vld [vmem:[%s1788_s2 + $0x30] sm:$0xff] (!%p166_p3)  ;;  %v233_v11 = vld [vmem:[%s1787_s1 + $0x8] sm:$0xff] (!%p166_p3) }
   0x9   : > { %252 = vperm.xlu1 (!%p166_p3), %1348, %v238_v3   ;;  %v1243_v12 = vld [vmem:[%s1788_s2 + $0x38] sm:$0xff] (!%p166_p3)  ;;  %v234_v13 = vld [vmem:[%s1787_s1 + $0x10] sm:$0xff] (!%p166_p3)  ;;  %v1236_v15 = vld [vmem:[%s1787_s1 + $0x20] sm:$0xff] (!%p166_p3) }
   0xa   : > { %v235_v14 = vld [vmem:[%s1787_s1 + $0x18] sm:$0xff] (!%p166_p3)  ;;  %1299 = vmatprep.mubr.msk.f32.mxu1 (!%p166_p3), %vm260_vm0, %v1236_v15 }
   0xc   : > { %247 = vperm.xlu0 (!%p166_p3), %1347, %v237_v4  }
   0xd   : > { %257 = vperm.xlu1 (!%p166_p3), %1348, %v239_v5  }
   0xe   : > { %s1795_s12 = smov (!%p199_p4, %s1399_s12), 1 }
   0xf   : > { %s1250_s24 = sshll.u32 %s1795_s12, 4 }
  0x10   : > { %s206_s29 = scalar_lea.vmem %s1786_s0, %s1250_s24  ;;  %470 = vperm.xlu0 %1347, %v1240_v8  }
  0x11   : > { %v1471_v6 = vld [vmem:[%s206_s29] sm:$0xff]   ;;  %v1473_v7 = vld [vmem:[%s206_s29 + $0x8] sm:$0xff]   ;;  %475 = vperm.xlu1 %1348, %v1241_v9   ;;  %s1251_s29 = sshll.u32 %s1795_s12, 9 }
  0x12   : > { %1306 = vmatprep.subr.bf16.mxu0 %v1471_v6  ;;  %s1595_s5 = scalar_lea.vmem %s1789_s3, %s1251_s29 }
  0x13   : > { %1308 = vmatpush3.bf16.msra.mxu0 %v1471_v6 }
  0x14   : > { %1310 = vmatprep.subr.bf16.mxu0 %v1473_v7  ;;  %480 = vperm.xlu0 %1347, %v1242_v10  }
  0x15   : > { %485 = vperm.xlu1 %1348, %v1243_v12  }
  0x17   : > { %1312 = vmatpush3.bf16.msra.mxu0 %v1473_v7 }
  0x1a   : > { %1286 = vmatmul.mubr.msk.f32.vlgmr.msra.gmra.mrb[0].mxu0 %vm260_vm0, %v233_v11 }
  0x1b   : > { %1288 = vmatprep.mubr.msk.f32.mxu0 %vm260_vm0, %v234_v13 }
  0x1e   : > { %1289 = vmatmul.mubr.msk.f32.gmra.mrb[2].mxu0 %vm260_vm0, %v235_v14 }
  0x87   : > { %v243_v16 = vpop.permute.xlu0 %242 }
  0x88   : > { %v253_v17 = vpop.permute.xlu1 %252 }
  0x8b   : > { %v248_v18 = vpop.permute.xlu0 %247 }
  0x8c   : > { %v258_v24 = vpop.permute.xlu1 %257 }
  0xed   : > { %v1287_v19 = vpop.f32.mrb[0].mxu0 }
  0xee   : > { %v1507_v20 = vadd.f32 %v1287_v19, %v248_v18  ;;  %v339_v21 = vpop.f32.mrb[1].mxu0 }
  0xef   : > { %v1509_v22 = vadd.f32 %v339_v21, %v243_v16 }
  0xf0   : > { %v359_v23 = vand.u32 2147483647, %v1507_v20  ;;  %v411_v40 = vmul.f32 -0.5, %v1507_v20  ;;  %vm435_vm1 = vcmp.ge.f32.partialorder %v1507_v20, 0.0 }
  0xf1   : > { %v358_v25 = vand.u32 2147483647, %v1509_v22  ;;  %v1290_v26 = vpop.f32.mrb[2].mxu0  ;;  %v410_v41 = vmul.f32 -0.5, %v1509_v22  ;;  %vm434_vm2 = vcmp.ge.f32.partialorder %v1509_v22, 0.0 }
  0xf2   : > { %v363_v27 = vmul.f32 0.23164189, %v359_v23  ;;  %v1513_v28 = vadd.f32 %v1290_v26, %v258_v24  ;;  %v349_v29 = vpop.f32.mrb[3].mxu0  ;;  %v415_v43 = vmul.f32 %v411_v40, %v1507_v20 }
  0xf3   : > { %v362_v30 = vmul.f32 0.23164189, %v358_v25  ;;  %v1515_v31 = vadd.f32 %v349_v29, %v253_v17  ;;  %v414_v47 = vmul.f32 %v410_v41, %v1509_v22 }
  0xf4   : > { %v367_v32 = vadd.f32 1.0, %v363_v27  ;;  %v361_v33 = vand.u32 2147483647, %v1513_v28  ;;  %v413_v44 = vmul.f32 -0.5, %v1513_v28  ;;  %v420_v52 = vmul.f32 1.442695, %v415_v43 }
  0xf5   : > { %v366_v34 = vadd.f32 1.0, %v362_v30  ;;  %v360_v35 = vand.u32 2147483647, %v1515_v31  ;;  %v412_v48 = vmul.f32 -0.5, %v1515_v31  ;;  %v418_v58 = vmul.f32 1.442695, %v414_v47 }
  0xf6   : > { %1353 = vrcp.f32 %v367_v32  ;;  %v365_v36 = vmul.f32 0.23164189, %v361_v33  ;;  %v417_v53 = vmul.f32 %v413_v44, %v1513_v28  ;;  %vm437_vm3 = vcmp.ge.f32.partialorder %v1513_v28, 0.0 }
  0xf7   : > { %v364_v37 = vmul.f32 0.23164189, %v360_v35  ;;  %1355 = vrcp.f32 %v366_v34  ;;  %v416_v59 = vmul.f32 %v412_v48, %v1515_v31  ;;  %v447_v48 = vmul.f32 0.5, %v1507_v20 }
  0xf8   : > { %v369_v38 = vadd.f32 1.0, %v365_v36  ;;  %v424_v0 = vmul.f32 1.442695, %v417_v53  ;;  %v446_v53 = vmul.f32 0.5, %v1509_v22  ;;  %vm436_vm4 = vcmp.ge.f32.partialorder %v1515_v31, 0.0 }
  0xf9   : > { %v368_v39 = vadd.f32 1.0, %v364_v37  ;;  %v422_v5 = vmul.f32 1.442695, %v416_v59  ;;  %v449_v59 = vmul.f32 0.5, %v1513_v28  ;;  %v1238_v28 = vld [vmem:[%s1787_s1 + $0x30] sm:$0xff] }
  0xfa   : > { %1357 = vrcp.f32 %v369_v38 }
  0xfb   : > { %1359 = vrcp.f32 %v368_v39 }
  0xfc   : > { %1361 = vpow2.f32 %v420_v52 }
  0xfd   : > { %1363 = vpow2.f32 %v418_v58 }
  0xfe   : > { %1365 = vpow2.f32 %v424_v0 }
  0xff   : > { %1367 = vpow2.f32 %v422_v5 }
 0x100   : > { %v1354_v42 = vpop.eup %1353 }
 0x101   : > { %v375_v45 = vmul.f32 1.0614054, %v1354_v42  ;;  %v1356_v46 = vpop.eup %1355 }
 0x102   : > { %v374_v49 = vmul.f32 1.0614054, %v1356_v46 }
 0x103   : > { %v379_v50 = vadd.f32 -1.4531521, %v375_v45 }
 0x104   : > { %v1358_v51 = vpop.eup %1357  ;;  %v378_v54 = vadd.f32 -1.4531521, %v374_v49 }
 0x105   : > { %v383_v55 = vmul.f32 %v1354_v42, %v379_v50  ;;  %v377_v56 = vmul.f32 1.0614054, %v1358_v51  ;;  %v1360_v57 = vpop.eup %1359 }
 0x106   : > { %v382_v60 = vmul.f32 %v1356_v46, %v378_v54  ;;  %v376_v62 = vmul.f32 1.0614054, %v1360_v57  ;;  %v1362_v26 = vpop.eup %1361 }
 0x107   : > { %v387_v61 = vadd.f32 1.4214138, %v383_v55  ;;  %v381_v63 = vadd.f32 -1.4531521, %v377_v56  ;;  %v1364_v33 = vpop.eup %1363 }
 0x108   : > { %v386_v1 = vadd.f32 1.4214138, %v382_v60  ;;  %v380_v3 = vadd.f32 -1.4531521, %v376_v62  ;;  %v1366_v38 = vpop.eup %1365  ;;  %v448_v62 = vmul.f32 0.5, %v1515_v31  ;;  %v1239_v31 = vld [vmem:[%s1787_s1 + $0x38] sm:$0xff] }
 0x109   : > { %v391_v2 = vmul.f32 %v1354_v42, %v387_v61  ;;  %v385_v4 = vmul.f32 %v1358_v51, %v381_v63  ;;  %v1368_v44 = vpop.eup %1367 }
 0x10a   : > { %v390_v8 = vmul.f32 %v1356_v46, %v386_v1  ;;  %v384_v10 = vmul.f32 %v1360_v57, %v380_v3  ;;  %v476_v3 = vpop.permute.xlu1 %475 }
 0x10b   : > { %v395_v9 = vadd.f32 -0.28449672, %v391_v2  ;;  %v389_v11 = vadd.f32 1.4214138, %v385_v4  ;;  %v1237_v2 = vld [vmem:[%s1787_s1 + $0x28] sm:$0xff]  ;;  %v471_v4 = vpop.permute.xlu0 %470 }
 0x10c   : > { %v394_v12 = vadd.f32 -0.28449672, %v390_v8  ;;  %v388_v14 = vadd.f32 1.4214138, %v384_v10 }
 0x10d   : > { %v399_v13 = vmul.f32 %v1354_v42, %v395_v9  ;;  %v393_v15 = vmul.f32 %v1358_v51, %v389_v11 }
 0x10e   : > { %v398_v16 = vmul.f32 %v1356_v46, %v394_v12  ;;  %v392_v18 = vmul.f32 %v1360_v57, %v388_v14  ;;  %v486_v12 = vpop.permute.xlu1 %485 }
 0x10f   : > { %v403_v17 = vadd.f32 0.2548296, %v399_v13  ;;  %v397_v19 = vadd.f32 -0.28449672, %v393_v15  ;;  %v481_v15 = vpop.permute.xlu0 %480 }
 0x110   : > { %v402_v21 = vadd.f32 0.2548296, %v398_v16  ;;  %v396_v24 = vadd.f32 -0.28449672, %v392_v18 }
 0x111   : > { %v407_v23 = vmul.f32 %v1354_v42, %v403_v17  ;;  %v401_v25 = vmul.f32 %v1358_v51, %v397_v19 }
 0x112   : > { %v406_v27 = vmul.f32 %v1356_v46, %v402_v21  ;;  %v400_v30 = vmul.f32 %v1360_v57, %v396_v24 }
 0x113   : > { %v427_v29 = vmul.f32 %v1362_v26, %v407_v23  ;;  %v405_v32 = vadd.f32 0.2548296, %v401_v25 }
 0x114   : > { %v426_v34 = vmul.f32 %v1364_v33, %v406_v27  ;;  %v404_v36 = vadd.f32 0.2548296, %v400_v30 }
 0x115   : > { %v431_v35 = vsub.f32 1.0, %v427_v29  ;;  %v409_v37 = vmul.f32 %v1358_v51, %v405_v32 }
 0x116   : > { %v430_v39 = vsub.f32 1.0, %v426_v34  ;;  %v408_v41 = vmul.f32 %v1360_v57, %v404_v36 }
 0x117   : > { %v439_v40 = vsub.f32 0.0, %v431_v35  ;;  %v429_v43 = vmul.f32 %v1366_v38, %v409_v37 }
 0x118   : > { %v438_v42 = vsub.f32 0.0, %v430_v39  ;;  %v428_v47 = vmul.f32 %v1368_v44, %v408_v41 }
 0x119   : > { %v443_v45 = vsel %vm435_vm1, %v431_v35, %v439_v40  ;;  %v433_v46 = vsub.f32 1.0, %v429_v43 }
 0x11a   : > { %v451_v49 = vadd.f32 1.0, %v443_v45  ;;  %v442_v50 = vsel %vm434_vm2, %v430_v39, %v438_v42  ;;  %v432_v52 = vsub.f32 1.0, %v428_v47 }
 0x11b   : > { %v441_v51 = vsub.f32 0.0, %v433_v46  ;;  %v450_v54 = vadd.f32 1.0, %v442_v50 }
 0x11c   : > { %v455_v55 = vmul.f32 %v451_v49, %v447_v48  ;;  %v440_v56 = vsub.f32 0.0, %v432_v52 }
 0x11d   : > { %v445_v57 = vsel %vm437_vm3, %v433_v46, %v441_v51  ;;  %v454_v58 = vmul.f32 %v450_v54, %v446_v53 }
 0x11e   : > { %v453_v60 = vadd.f32 1.0, %v445_v57  ;;  %v444_v61 = vsel %vm436_vm4, %v432_v52, %v440_v56 }
 0x11f   : > { %v1313_v20 = vpack.c.bf16 %v455_v55, %v454_v58  ;;  %v452_v63 = vadd.f32 1.0, %v444_v61 }
 0x120   : > { %v457_v0 = vmul.f32 %v453_v60, %v449_v59 }
 0x121   : > { %1314 = vmatprep.subr.bf16.mxu1 %v1313_v20  ;;  %v456_v22 = vmul.f32 %v452_v63, %v448_v62 }
 0x122   : > { %1316 = vmatpush3.bf16.msra.mxu1 %v1313_v20 }
 0x123   : > { %v1317_v1 = vpack.c.bf16 %v457_v0, %v456_v22 }
 0x125   : > { %1318 = vmatprep.subr.bf16.mxu1 %v1317_v1 }
 0x126   : > { %1320 = vmatpush3.bf16.msra.mxu1 %v1317_v1 }
 0x129   : > { %1300 = vmatmul.mubr.msk.f32.vlgmr.msra.gmra.mrb[0].mxu1 %vm260_vm0, %v1237_v2 }
 0x12a   : > { %1302 = vmatprep.mubr.msk.f32.mxu1 %vm260_vm0, %v1238_v28 }
 0x12d   : > { %1303 = vmatmul.mubr.msk.f32.gmra.mrb[2].mxu1 %vm260_vm0, %v1239_v31 }
 0x1fc   : > { %v1301_v5 = vpop.f32.mrb[0].mxu1 }
 0x1fd   : > { %v1547_v8 = vadd.f32 %v1301_v5, %v476_v3  ;;  %v566_v9 = vpop.f32.mrb[1].mxu1 }
 0x1fe   : > { %v1549_v10 = vadd.f32 %v566_v9, %v471_v4 }
 0x1ff   : > { %v586_v11 = vand.u32 2147483647, %v1547_v8  ;;  %v638_v33 = vmul.f32 -0.5, %v1547_v8  ;;  %vm662_vm5 = vcmp.ge.f32.partialorder %v1547_v8, 0.0 }
 0x200   : > { %v585_v13 = vand.u32 2147483647, %v1549_v10  ;;  %v1304_v14 = vpop.f32.mrb[2].mxu1  ;;  %v637_v34 = vmul.f32 -0.5, %v1549_v10  ;;  %vm661_vm6 = vcmp.ge.f32.partialorder %v1549_v10, 0.0 }
 0x201   : > { %v590_v16 = vmul.f32 0.23164189, %v586_v11  ;;  %v1553_v17 = vadd.f32 %v1304_v14, %v486_v12  ;;  %v576_v18 = vpop.f32.mrb[3].mxu1  ;;  %v642_v36 = vmul.f32 %v638_v33, %v1547_v8 }
 0x202   : > { %v589_v19 = vmul.f32 0.23164189, %v585_v13  ;;  %v1555_v21 = vadd.f32 %v576_v18, %v481_v15  ;;  %v641_v40 = vmul.f32 %v637_v34, %v1549_v10 }
 0x203   : > { %v594_v23 = vadd.f32 1.0, %v590_v16  ;;  %v588_v24 = vand.u32 2147483647, %v1553_v17  ;;  %v640_v37 = vmul.f32 -0.5, %v1553_v17  ;;  %v647_v45 = vmul.f32 1.442695, %v642_v36 }
 0x204   : > { %v593_v25 = vadd.f32 1.0, %v589_v19  ;;  %v587_v27 = vand.u32 2147483647, %v1555_v21  ;;  %v639_v41 = vmul.f32 -0.5, %v1555_v21  ;;  %v645_v52 = vmul.f32 1.442695, %v641_v40 }
 0x205   : > { %1369 = vrcp.f32 %v594_v23  ;;  %v592_v26 = vmul.f32 0.23164189, %v588_v24  ;;  %v644_v47 = vmul.f32 %v640_v37, %v1553_v17  ;;  %v1259_v40 = vunpack.c.h.bf16 %v1473_v7 }
 0x206   : > { %1371 = vrcp.f32 %v593_v25  ;;  %v591_v30 = vmul.f32 0.23164189, %v587_v27  ;;  %v643_v51 = vmul.f32 %v639_v41, %v1555_v21  ;;  %vm664_vm7 = vcmp.ge.f32.partialorder %v1553_v17, 0.0 }
 0x207   : > { %v596_v29 = vadd.f32 1.0, %v592_v26  ;;  %v651_v57 = vmul.f32 1.442695, %v644_v47  ;;  %v1410_v47 = vmov 1966171168   ;;  %vm663_vm9 = vcmp.ge.f32.partialorder %v1555_v21, 0.0 }
 0x208   : > { %v595_v32 = vadd.f32 1.0, %v591_v30  ;;  %v649_v20 = vmul.f32 1.442695, %v643_v51  ;;  %v673_v51 = vmul.f32 0.5, %v1549_v10 }
 0x209   : > { %1373 = vrcp.f32 %v596_v29 }
 0x20a   : > { %1375 = vrcp.f32 %v595_v32 }
 0x20b   : > { %1377 = vpow2.f32 %v647_v45 }
 0x20c   : > { %1379 = vpow2.f32 %v645_v52 }
 0x20d   : > { %1381 = vpow2.f32 %v651_v57 }
 0x20e   : > { %1383 = vpow2.f32 %v649_v20 }
 0x20f   : > { %v1370_v35 = vpop.eup %1369 }
 0x210   : > { %v602_v38 = vmul.f32 1.0614054, %v1370_v35  ;;  %v1372_v39 = vpop.eup %1371 }
 0x211   : > { %v601_v44 = vmul.f32 1.0614054, %v1372_v39 }
 0x212   : > { %v606_v43 = vadd.f32 -1.4531521, %v602_v38  ;;  %v1255_v38 = vunpack.c.h.bf16 %v1471_v6 }
 0x213   : > { %v1374_v42 = vpop.eup %1373  ;;  %v605_v48 = vadd.f32 -1.4531521, %v601_v44 }
 0x214   : > { %v610_v46 = vmul.f32 %v1370_v35, %v606_v43  ;;  %v604_v49 = vmul.f32 1.0614054, %v1374_v42  ;;  %v1376_v50 = vpop.eup %1375 }
 0x215   : > { %v609_v54 = vmul.f32 %v1372_v39, %v605_v48  ;;  %v603_v56 = vmul.f32 1.0614054, %v1376_v50  ;;  %v1378_v15 = vpop.eup %1377  ;;  %v706_v48 = vlaneseq }
 0x216   : > { %v614_v53 = vadd.f32 1.4214138, %v610_v46  ;;  %v608_v55 = vadd.f32 -1.4531521, %v604_v49  ;;  %v1380_v24 = vpop.eup %1379  ;;  %v704_v46 = vunpack.c.l.s4 %v1410_v47 }
 0x217   : > { %v613_v59 = vadd.f32 1.4214138, %v609_v54  ;;  %v607_v61 = vadd.f32 -1.4531521, %v603_v56  ;;  %v1382_v30 = vpop.eup %1381 }
 0x218   : > { %v618_v58 = vmul.f32 %v1370_v35, %v614_v53  ;;  %v612_v60 = vmul.f32 %v1374_v42, %v608_v55  ;;  %v1384_v37 = vpop.eup %1383  ;;  %v676_v55 = vmul.f32 0.5, %v1553_v17 }
 0x219   : > { %v617_v63 = vmul.f32 %v1372_v39, %v613_v59  ;;  %v611_v22 = vmul.f32 %v1376_v50, %v607_v61  ;;  %v1258_v59 = vunpack.c.l.bf16 %v1473_v7  ;;  %v707_v61 = vshrl.u32 %v706_v48, 7 }
 0x21a   : > { %v622_v62 = vadd.f32 -0.28449672, %v618_v58  ;;  %v616_v0 = vadd.f32 1.4214138, %v612_v60  ;;  %v705_v60 = vunpack.c.0.s8 %v704_v46 }
 0x21b   : > { %v621_v2 = vadd.f32 -0.28449672, %v617_v63  ;;  %v615_v31 = vadd.f32 1.4214138, %v611_v22  ;;  %v675_v63 = vmul.f32 0.5, %v1555_v21 }
 0x21c   : > { %v626_v1 = vmul.f32 %v1370_v35, %v622_v62  ;;  %v620_v28 = vmul.f32 %v1374_v42, %v616_v0 }
 0x21d   : > { %v625_v4 = vmul.f32 %v1372_v39, %v621_v2  ;;  %v619_v9 = vmul.f32 %v1376_v50, %v615_v31 }
 0x21e   : > { %v630_v3 = vadd.f32 0.2548296, %v626_v1  ;;  %v624_v5 = vadd.f32 -0.28449672, %v620_v28  ;;  %v1581_v1 = vsub.s32 %v705_v60, %v707_v61 }
 0x21f   : > { %v629_v12 = vadd.f32 0.2548296, %v625_v4  ;;  %v623_v14 = vadd.f32 -0.28449672, %v619_v9 }
 0x220   : > { %v634_v11 = vmul.f32 %v1370_v35, %v630_v3  ;;  %v628_v13 = vmul.f32 %v1374_v42, %v624_v5  ;;  %v1254_v35 = vunpack.c.l.bf16 %v1471_v6  ;;  %v1587_v3 = vsub.s32 0, %v707_v61 }
 0x221   : > { %v633_v18 = vmul.f32 %v1372_v39, %v629_v12  ;;  %v627_v23 = vmul.f32 %v1376_v50, %v623_v14 }
 0x222   : > { %v654_v16 = vmul.f32 %v1378_v15, %v634_v11  ;;  %v632_v19 = vadd.f32 0.2548296, %v628_v13 }
 0x223   : > { %v653_v26 = vmul.f32 %v1380_v24, %v633_v18  ;;  %v631_v29 = vadd.f32 0.2548296, %v627_v23 }
 0x224   : > { %v658_v25 = vsub.f32 1.0, %v654_v16  ;;  %v636_v27 = vmul.f32 %v1374_v42, %v632_v19  ;;  %v674_v42 = vmul.f32 0.5, %v1547_v8 }
 0x225   : > { %v657_v33 = vsub.f32 1.0, %v653_v26  ;;  %v635_v36 = vmul.f32 %v1376_v50, %v631_v29 }
 0x226   : > { %v666_v32 = vsub.f32 0.0, %v658_v25  ;;  %v656_v34 = vmul.f32 %v1382_v30, %v636_v27 }
 0x227   : > { %v665_v41 = vsub.f32 0.0, %v657_v33  ;;  %v655_v44 = vmul.f32 %v1384_v37, %v635_v36 }
 0x228   : > { %v670_v39 = vsel %vm662_vm5, %v658_v25, %v666_v32  ;;  %v660_v43 = vsub.f32 1.0, %v656_v34 }
 0x229   : > { %v678_v45 = vadd.f32 1.0, %v670_v39  ;;  %v669_v49 = vsel %vm661_vm6, %v657_v33, %v665_v41  ;;  %v659_v52 = vsub.f32 1.0, %v655_v44 }
 0x22a   : > { %v668_v50 = vsub.f32 0.0, %v660_v43  ;;  %v677_v53 = vadd.f32 1.0, %v669_v49 }
 0x22b   : > { %v682_v6 = vmul.f32 %v678_v45, %v674_v42  ;;  %v667_v8 = vsub.f32 0.0, %v659_v52 }
 0x22c   : > { %v672_v54 = vsel %vm664_vm7, %v660_v43, %v668_v50  ;;  %v681_v57 = vmul.f32 %v677_v53, %v673_v51 }
 0x22d   : > { %v686_v56 = vadd.f32 %v1255_v38, %v682_v6  ;;  %v680_v58 = vadd.f32 1.0, %v672_v54  ;;  %v671_v20 = vsel %vm663_vm9, %v659_v52, %v667_v8 }
 0x22e   : > { %v685_v10 = vadd.f32 %v1254_v35, %v681_v57  ;;  %v679_v0 = vadd.f32 1.0, %v671_v20 }
 0x22f   : > { %691 = vst.msk [vmem:[#allocation2 + $0x8] sm:$0xff] %vm689_vm8, %v686_v56  ;;  %v684_v62 = vmul.f32 %v680_v58, %v676_v55 }
 0x230   : > { %690 = vst.msk [vmem:[#allocation2] sm:$0xff] %vm689_vm8, %v685_v10  ;;  %v683_v22 = vmul.f32 %v679_v0, %v675_v63 }
 0x231   : > { %v688_v17 = vadd.f32 %v1259_v40, %v684_v62 }
 0x232   : > { %v687_v7 = vadd.f32 %v1258_v59, %v683_v22 }
 0x233   : > { %693 = vst.msk [vmem:[#allocation2 + $0x18] sm:$0xff] %vm689_vm8, %v688_v17 }
 0x234   : > { %692 = vst.msk [vmem:[#allocation2 + $0x10] sm:$0xff] %vm689_vm8, %v687_v7 }
 0x236   : > { %v695_v2 = vld [vmem:[#allocation2 + $0x8] sm:$0xff] }
 0x237   : > { %v751_v28 = vcombine.high %v695_v2, %v695_v2  ;;  %v758_v31 = vrot.slane %v695_v2, %v1581_v1  ;;  %v694_v21 = vld [vmem:[#allocation2] sm:$0xff] }
 0x238   : > { %v702_v11 = vcombine.high %v694_v21, %v694_v21  ;;  %v709_v12 = vrot.slane %v694_v21, %v1581_v1 }
 0x239   : > { %v765_v4 = vrot.slane %v751_v28, %v1581_v1  ;;  %v766_v5 = vcombine.high %v758_v31, %v758_v31  ;;  %v774_v9 = vrot.slane %v758_v31, %v1581_v1 }
 0x23a   : > { %v716_v19 = vrot.slane %v702_v11, %v1581_v1  ;;  %v717_v23 = vcombine.high %v709_v12, %v709_v12  ;;  %v725_v24 = vrot.slane %v709_v12, %v1581_v1  ;;  %v697_v36 = vld [vmem:[#allocation2 + $0x18] sm:$0xff] }
 0x23b   : > { %v767_v13 = vcombine.high %v765_v4, %v765_v4  ;;  %v781_v14 = vrot.slane %v765_v4, %v1581_v1  ;;  %v788_v15 = vrot.slane %v766_v5, %v1581_v1  ;;  %v796_v16 = vcombine.high %v774_v9, %v774_v9  ;;  %v696_v48 = vld [vmem:[#allocation2 + $0x10] sm:$0xff] }
 0x23c   : > { %v933_v18 = vrot.slane %v774_v9, %v1587_v3  ;;  %v718_v33 = vcombine.high %v716_v19, %v716_v19  ;;  %v732_v34 = vrot.slane %v716_v19, %v1581_v1  ;;  %v739_v39 = vrot.slane %v717_v23, %v1581_v1 }
 0x23d   : > { %v795_v25 = vrot.slane %v767_v13, %v1581_v1  ;;  %v797_v26 = vcombine.high %v781_v14, %v781_v14  ;;  %v798_v27 = vcombine.high %v788_v15, %v788_v15  ;;  %v937_v29 = vrot.slane %v788_v15, %v1587_v3 }
 0x23e   : > { %v941_v30 = vrot.slane %v796_v16, %v1587_v3  ;;  %v949_v32 = vrot.slane %v781_v14, %v1587_v3  ;;  %1075 = vst.msk [vmem:[%s1595_s5 + $0x80] sm:$0xff] %vm689_vm8, %v933_v18  ;;  %1076 = vst.msk [vmem:[%s1595_s5 + $0x88] sm:$0xff] %vm689_vm8, %v933_v18  ;;  %v746_v41 = vrot.slane %v718_v33, %v1581_v1 }
 0x23f   : > { %v799_v37 = vcombine.high %v795_v25, %v795_v25  ;;  %v945_v35 = vrot.slane %v798_v27, %v1587_v3  ;;  %v953_v38 = vrot.slane %v795_v25, %v1587_v3  ;;  %v957_v40 = vrot.slane %v797_v26, %v1587_v3  ;;  %1077 = vst.msk [vmem:[%s1595_s5 + $0x90] sm:$0xff] %vm689_vm8, %v937_v29 }
 0x240   : > { %1078 = vst.msk [vmem:[%s1595_s5 + $0x98] sm:$0xff] %vm689_vm8, %v937_v29  ;;  %1079 = vst.msk [vmem:[%s1595_s5 + $0xa0] sm:$0xff] %vm689_vm8, %v941_v30  ;;  %v747_v43 = vcombine.high %v725_v24, %v725_v24  ;;  %v748_v44 = vcombine.high %v732_v34, %v732_v34  ;;  %v901_v45 = vrot.slane %v725_v24, %v1587_v3 }
 0x241   : > { %1080 = vst.msk [vmem:[%s1595_s5 + $0xa8] sm:$0xff] %vm689_vm8, %v941_v30  ;;  %1083 = vst.msk [vmem:[%s1595_s5 + $0xc0] sm:$0xff] %vm689_vm8, %v949_v32  ;;  %v961_v42 = vrot.slane %v799_v37, %v1587_v3  ;;  %v917_v47 = vrot.slane %v732_v34, %v1587_v3  ;;  %v849_v46 = vcombine.high %v697_v36, %v697_v36 }
 0x242   : > { %1084 = vst.msk [vmem:[%s1595_s5 + $0xc8] sm:$0xff] %vm689_vm8, %v949_v32  ;;  %1081 = vst.msk [vmem:[%s1595_s5 + $0xb0] sm:$0xff] %vm689_vm8, %v945_v35  ;;  %v749_v49 = vcombine.high %v739_v39, %v739_v39  ;;  %v750_v50 = vcombine.high %v746_v41, %v746_v41  ;;  %v905_v52 = vrot.slane %v739_v39, %v1587_v3 }
 0x243   : > { %1082 = vst.msk [vmem:[%s1595_s5 + $0xb8] sm:$0xff] %vm689_vm8, %v945_v35  ;;  %1085 = vst.msk [vmem:[%s1595_s5 + $0xd0] sm:$0xff] %vm689_vm8, %v953_v38  ;;  %v909_v6 = vrot.slane %v747_v43, %v1587_v3  ;;  %v921_v51 = vrot.slane %v746_v41, %v1587_v3  ;;  %v925_v53 = vrot.slane %v748_v44, %v1587_v3 }
 0x244   : > { %1086 = vst.msk [vmem:[%s1595_s5 + $0xd8] sm:$0xff] %vm689_vm8, %v953_v38  ;;  %1087 = vst.msk [vmem:[%s1595_s5 + $0xe0] sm:$0xff] %vm689_vm8, %v957_v40  ;;  %v856_v54 = vrot.slane %v697_v36, %v1581_v1  ;;  %v863_v55 = vrot.slane %v849_v46, %v1581_v1  ;;  %v913_v8 = vrot.slane %v749_v49, %v1587_v3 }
 0x245   : > { %1088 = vst.msk [vmem:[%s1595_s5 + $0xe8] sm:$0xff] %vm689_vm8, %v957_v40  ;;  %1089 = vst.msk [vmem:[%s1595_s5 + $0xf0] sm:$0xff] %vm689_vm8, %v961_v42  ;;  %v929_v56 = vrot.slane %v750_v50, %v1587_v3  ;;  %v800_v57 = vcombine.high %v696_v48, %v696_v48  ;;  %v807_v58 = vrot.slane %v696_v48, %v1581_v1 }
 0x246   : > { %1090 = vst.msk [vmem:[%s1595_s5 + $0xf8] sm:$0xff] %vm689_vm8, %v961_v42  ;;  %1059 = vst.msk [vmem:[%s1595_s5] sm:$0xff] %vm689_vm8, %v901_v45  ;;  %v864_v59 = vcombine.high %v856_v54, %v856_v54  ;;  %v865_v60 = vcombine.high %v863_v55, %v863_v55  ;;  %v872_v61 = vrot.slane %v856_v54, %v1581_v1 }
 0x247   : > { %1060 = vst.msk [vmem:[%s1595_s5 + $0x8] sm:$0xff] %vm689_vm8, %v901_v45  ;;  %1067 = vst.msk [vmem:[%s1595_s5 + $0x40] sm:$0xff] %vm689_vm8, %v917_v47  ;;  %v879_v20 = vrot.slane %v863_v55, %v1581_v1  ;;  %v814_v10 = vrot.slane %v800_v57, %v1581_v1  ;;  %v815_v62 = vcombine.high %v807_v58, %v807_v58 }
 0x248   : > { %1068 = vst.msk [vmem:[%s1595_s5 + $0x48] sm:$0xff] %vm689_vm8, %v917_v47  ;;  %1061 = vst.msk [vmem:[%s1595_s5 + $0x10] sm:$0xff] %vm689_vm8, %v905_v52  ;;  %v823_v63 = vrot.slane %v807_v58, %v1581_v1  ;;  %v886_v0 = vrot.slane %v864_v59, %v1581_v1  ;;  %v893_v17 = vrot.slane %v865_v60, %v1581_v1 }
 0x249   : > { %1062 = vst.msk [vmem:[%s1595_s5 + $0x18] sm:$0xff] %vm689_vm8, %v905_v52  ;;  %1063 = vst.msk [vmem:[%s1595_s5 + $0x20] sm:$0xff] %vm689_vm8, %v909_v6  ;;  %v894_v22 = vcombine.high %v872_v61, %v872_v61  ;;  %v895_v7 = vcombine.high %v879_v20, %v879_v20  ;;  %v997_v2 = vrot.slane %v872_v61, %v1587_v3 }
 0x24a   : > { %1064 = vst.msk [vmem:[%s1595_s5 + $0x28] sm:$0xff] %vm689_vm8, %v909_v6  ;;  %1069 = vst.msk [vmem:[%s1595_s5 + $0x50] sm:$0xff] %vm689_vm8, %v921_v51  ;;  %v1013_v28 = vrot.slane %v879_v20, %v1587_v3  ;;  %v816_v31 = vcombine.high %v814_v10, %v814_v10  ;;  %v830_v21 = vrot.slane %v814_v10, %v1581_v1 }
 0x24b   : > { %1070 = vst.msk [vmem:[%s1595_s5 + $0x58] sm:$0xff] %vm689_vm8, %v921_v51  ;;  %1071 = vst.msk [vmem:[%s1595_s5 + $0x60] sm:$0xff] %vm689_vm8, %v925_v53  ;;  %v896_v4 = vcombine.high %v886_v0, %v886_v0  ;;  %v897_v5 = vcombine.high %v893_v17, %v893_v17  ;;  %v1001_v9 = vrot.slane %v886_v0, %v1587_v3 }
 0x24c   : > { %1072 = vst.msk [vmem:[%s1595_s5 + $0x68] sm:$0xff] %vm689_vm8, %v925_v53  ;;  %1065 = vst.msk [vmem:[%s1595_s5 + $0x30] sm:$0xff] %vm689_vm8, %v913_v8  ;;  %v1005_v11 = vrot.slane %v894_v22, %v1587_v3  ;;  %v1017_v12 = vrot.slane %v893_v17, %v1587_v3  ;;  %v1021_v13 = vrot.slane %v895_v7, %v1587_v3 }
 0x24d   : > { %1066 = vst.msk [vmem:[%s1595_s5 + $0x38] sm:$0xff] %vm689_vm8, %v913_v8  ;;  %1073 = vst.msk [vmem:[%s1595_s5 + $0x70] sm:$0xff] %vm689_vm8, %v929_v56  ;;  %v837_v14 = vrot.slane %v815_v62, %v1581_v1  ;;  %v844_v15 = vrot.slane %v816_v31, %v1581_v1  ;;  %v1009_v16 = vrot.slane %v896_v4, %v1587_v3 }
 0x24e   : > { %1074 = vst.msk [vmem:[%s1595_s5 + $0x78] sm:$0xff] %vm689_vm8, %v929_v56  ;;  %1107 = vst.msk [vmem:[%s1595_s5 + $0x180] sm:$0xff] %vm689_vm8, %v997_v2  ;;  %v1025_v18 = vrot.slane %v897_v5, %v1587_v3  ;;  %v845_v19 = vcombine.high %v823_v63, %v823_v63  ;;  %v846_v23 = vcombine.high %v830_v21, %v830_v21 }
 0x24f   : > { %1108 = vst.msk [vmem:[%s1595_s5 + $0x188] sm:$0xff] %vm689_vm8, %v997_v2  ;;  %1115 = vst.msk [vmem:[%s1595_s5 + $0x1c0] sm:$0xff] %vm689_vm8, %v1013_v28  ;;  %v847_v1 = vcombine.high %v837_v14, %v837_v14  ;;  %v848_v24 = vcombine.high %v844_v15, %v844_v15  ;;  %v965_v25 = vrot.slane %v823_v63, %v1587_v3 }
 0x250   : > { %1116 = vst.msk [vmem:[%s1595_s5 + $0x1c8] sm:$0xff] %vm689_vm8, %v1013_v28  ;;  %1109 = vst.msk [vmem:[%s1595_s5 + $0x190] sm:$0xff] %vm689_vm8, %v1001_v9  ;;  %v969_v26 = vrot.slane %v837_v14, %v1587_v3  ;;  %v973_v27 = vrot.slane %v845_v19, %v1587_v3  ;;  %v981_v29 = vrot.slane %v830_v21, %v1587_v3 }
 0x251   : > { %1110 = vst.msk [vmem:[%s1595_s5 + $0x198] sm:$0xff] %vm689_vm8, %v1001_v9  ;;  %1111 = vst.msk [vmem:[%s1595_s5 + $0x1a0] sm:$0xff] %vm689_vm8, %v1005_v11  ;;  %v985_v30 = vrot.slane %v844_v15, %v1587_v3  ;;  %v989_v32 = vrot.slane %v846_v23, %v1587_v3  ;;  %v977_v33 = vrot.slane %v847_v1, %v1587_v3 }
 0x252   : > { %1112 = vst.msk [vmem:[%s1595_s5 + $0x1a8] sm:$0xff] %vm689_vm8, %v1005_v11  ;;  %1117 = vst.msk [vmem:[%s1595_s5 + $0x1d0] sm:$0xff] %vm689_vm8, %v1017_v12  ;;  %v993_v34 = vrot.slane %v848_v24, %v1587_v3 }
 0x253   : > { %1118 = vst.msk [vmem:[%s1595_s5 + $0x1d8] sm:$0xff] %vm689_vm8, %v1017_v12  ;;  %1119 = vst.msk [vmem:[%s1595_s5 + $0x1e0] sm:$0xff] %vm689_vm8, %v1021_v13 }
 0x254   : > { %1120 = vst.msk [vmem:[%s1595_s5 + $0x1e8] sm:$0xff] %vm689_vm8, %v1021_v13  ;;  %1113 = vst.msk [vmem:[%s1595_s5 + $0x1b0] sm:$0xff] %vm689_vm8, %v1009_v16 }
 0x255   : > { %1114 = vst.msk [vmem:[%s1595_s5 + $0x1b8] sm:$0xff] %vm689_vm8, %v1009_v16  ;;  %1121 = vst.msk [vmem:[%s1595_s5 + $0x1f0] sm:$0xff] %vm689_vm8, %v1025_v18 }
 0x256   : > { %1122 = vst.msk [vmem:[%s1595_s5 + $0x1f8] sm:$0xff] %vm689_vm8, %v1025_v18  ;;  %1091 = vst.msk [vmem:[%s1595_s5 + $0x100] sm:$0xff] %vm689_vm8, %v965_v25 }
 0x257   : > { %1092 = vst.msk [vmem:[%s1595_s5 + $0x108] sm:$0xff] %vm689_vm8, %v965_v25  ;;  %1093 = vst.msk [vmem:[%s1595_s5 + $0x110] sm:$0xff] %vm689_vm8, %v969_v26 }
 0x258   : > { %1094 = vst.msk [vmem:[%s1595_s5 + $0x118] sm:$0xff] %vm689_vm8, %v969_v26  ;;  %1095 = vst.msk [vmem:[%s1595_s5 + $0x120] sm:$0xff] %vm689_vm8, %v973_v27 }
 0x259   : > { %1096 = vst.msk [vmem:[%s1595_s5 + $0x128] sm:$0xff] %vm689_vm8, %v973_v27  ;;  %1099 = vst.msk [vmem:[%s1595_s5 + $0x140] sm:$0xff] %vm689_vm8, %v981_v29 }
 0x25a   : > { %1100 = vst.msk [vmem:[%s1595_s5 + $0x148] sm:$0xff] %vm689_vm8, %v981_v29  ;;  %1101 = vst.msk [vmem:[%s1595_s5 + $0x150] sm:$0xff] %vm689_vm8, %v985_v30 }
 0x25b   : > { %1102 = vst.msk [vmem:[%s1595_s5 + $0x158] sm:$0xff] %vm689_vm8, %v985_v30  ;;  %1103 = vst.msk [vmem:[%s1595_s5 + $0x160] sm:$0xff] %vm689_vm8, %v989_v32 }
 0x25c   : > { %1104 = vst.msk [vmem:[%s1595_s5 + $0x168] sm:$0xff] %vm689_vm8, %v989_v32  ;;  %1097 = vst.msk [vmem:[%s1595_s5 + $0x130] sm:$0xff] %vm689_vm8, %v977_v33 }
 0x25d   : > { %1098 = vst.msk [vmem:[%s1595_s5 + $0x138] sm:$0xff] %vm689_vm8, %v977_v33  ;;  %1105 = vst.msk [vmem:[%s1595_s5 + $0x170] sm:$0xff] %vm689_vm8, %v993_v34 }
 0x25e   : > { %1106 = vst.msk [vmem:[%s1595_s5 + $0x178] sm:$0xff] %vm689_vm8, %v993_v34 }
 0x25f PF: > { %s13_s14 = sadd.s32 1, %s1407_s14   ;;  %s1790_s12 = smov %s1403_s13 }
 0x260   : > { %p10_p5 = scmp.ge.s32.totalorder %s13_s14, 4   ;;  %s1791_s13 = smov %s1793_s15 }
 0x262   :  { %12 = sbr.rel (!%p10_p5) target bundleno = 2 (0x2), region = 68 }

</bundles_post_ra>
